<compile_context>
chip_gen: v6e
topology: v6e:2x2x1
jax: 0.10.0
libtpu: 0.0.40
codegen_flags: <defaults>
</compile_context>

<pallas_src>
import functools

import jax
import jax.numpy as jnp
from jax.experimental import pallas as pl
from jax.experimental.pallas import tpu as pltpu

EPS = 1e-6

# Keep the per-step double-buffered footprint well under the scoped-VMEM limit
# (v7x has only 64 MiB physical VMEM; v5e's 16 MiB default scope is raised via
# vmem_limit_bytes below).
_TILE_VMEM_BUDGET = 24 * 1024 * 1024
_MAX_TM = 1024

_COMPILER_PARAMS = pltpu.CompilerParams(
    dimension_semantics=("parallel",),      # rows are independent -> megacore on v7x
    vmem_limit_bytes=48 * 1024 * 1024,      # raise v5e's 16 MiB default scoped limit
)


def _round_up(x, m):
    return (x + m - 1) // m * m


def _sublane(dtype):
    # f32 -> 8, bf16 -> 16, int8/fp8 -> 32
    return max(8, 32 // jnp.dtype(dtype).itemsize)


def _pick_tm(n_rows, per_row_vmem_bytes, *, sublane,
             budget_bytes=_TILE_VMEM_BUDGET, max_tm=_MAX_TM):
    """Largest row tile whose (double-buffered) VMEM footprint fits the budget."""
    tm = budget_bytes // max(per_row_vmem_bytes, 1)
    tm = min(tm, max_tm, _round_up(n_rows, sublane))
    tm = max(sublane, (tm // sublane) * sublane)
    return int(tm)


def _maybe_pad_rows(a, r_pad):
    r = a.shape[0]
    return a if r == r_pad else jnp.pad(a, ((0, r_pad - r), (0, 0)))


# --------------------------------------------------------------------------
# Kernel 1: LayerNorm over the last dim (torch-style unbiased std).
# --------------------------------------------------------------------------
def _layernorm_kernel(params_ref, x_ref, o_ref):
    # params_ref: SMEM f32[2] = [alpha, bias]
    x = x_ref[...].astype(jnp.float32)                   # (tm, D)
    d = x.shape[-1]
    mean = jnp.mean(x, axis=-1, keepdims=True)
    diff = x - mean
    var = jnp.sum(diff * diff, axis=-1, keepdims=True) * (1.0 / max(d - 1, 1))
    inv = 1.0 / (jnp.sqrt(var) + EPS)                    # (tm, 1): per-row, not per-element
    o_ref[...] = (params_ref[0] * diff * inv + params_ref[1]).astype(o_ref.dtype)


def layernorm_pallas(x2d, params):
    R, D = x2d.shape
    itemsize = jnp.dtype(x2d.dtype).itemsize
    sublane = _sublane(x2d.dtype)
    per_row = 2 * 2 * D * itemsize                       # (in + out) x double buffer
    tm = _pick_tm(R, per_row, sublane=sublane)
    r_pad = _round_up(R, tm)
    xp = _maybe_pad_rows(x2d, r_pad)
    out = pl.pallas_call(
        _layernorm_kernel,
        out_shape=jax.ShapeDtypeStruct((r_pad, D), x2d.dtype),
        grid=(r_pad // tm,),
        in_specs=[
            pl.BlockSpec(memory_space=pltpu.MemorySpace.SMEM),   # alpha/bias scalars
            pl.BlockSpec((tm, D), lambda i: (i, 0)),
        ],
        out_specs=pl.BlockSpec((tm, D), lambda i: (i, 0)),
        compiler_params=_COMPILER_PARAMS,
    )(params, xp)
    return out[:R] if r_pad != R else out


# --------------------------------------------------------------------------
# Kernel 2: dropout (inverted, nn.Dropout train-mode) + residual add.
# --------------------------------------------------------------------------
def _dropout_add_kernel(*refs, p):
    if p > 0.0:                                          # static hyperparameter
        x_ref, y_ref, r_ref, o_ref = refs
        y = y_ref[...]
        keep = r_ref[...] >= jnp.float32(p)              # P(keep) = 1 - p
        y = jnp.where(keep, y * jnp.asarray(1.0 / (1.0 - p), y.dtype),
                      jnp.zeros_like(y))
    else:
        x_ref, y_ref, o_ref = refs
        y = y_ref[...]
    o_ref[...] = (x_ref[...] + y).astype(o_ref.dtype)


def dropout_add_pallas(x2d, y2d, rnd2d, p):
    R, D = x2d.shape
    p = float(p)
    itemsize = jnp.dtype(x2d.dtype).itemsize
    sublane = _sublane(x2d.dtype)
    per_row = 2 * D * (3 * itemsize + (4 if p > 0.0 else 0))   # x, y, out (+ f32 rnd)
    tm = _pick_tm(R, per_row, sublane=sublane)
    r_pad = _round_up(R, tm)

    inputs = [_maybe_pad_rows(x2d, r_pad), _maybe_pad_rows(y2d, r_pad)]
    in_specs = [pl.BlockSpec((tm, D), lambda i: (i, 0)),
                pl.BlockSpec((tm, D), lambda i: (i, 0))]
    if p > 0.0:
        inputs.append(_maybe_pad_rows(rnd2d, r_pad))
        in_specs.append(pl.BlockSpec((tm, D), lambda i: (i, 0)))

    out = pl.pallas_call(
        functools.partial(_dropout_add_kernel, p=p),
        out_shape=jax.ShapeDtypeStruct((r_pad, D), x2d.dtype),
        grid=(r_pad // tm,),
        in_specs=in_specs,
        out_specs=pl.BlockSpec((tm, D), lambda i: (i, 0)),
        compiler_params=_COMPILER_PARAMS,
    )(*inputs)
    return out[:R] if r_pad != R else out


# --------------------------------------------------------------------------
# Kernel 3: fully fused LN -> Linear sublayer -> dropout -> residual add.
# (Option A fusion; valid when the sublayer is a plain Linear d_model->d_model.)
# TODO(synk): block the matmul K axis for very large d_model where W does not
#             fit VMEM alongside the row tiles.
# --------------------------------------------------------------------------
def _fused_residual_linear_kernel(*refs, p):
    if p > 0.0:
        params_ref, x_ref, w_ref, b_ref, r_ref, o_ref = refs
    else:
        params_ref, x_ref, w_ref, b_ref, o_ref = refs
    x = x_ref[...]                                       # (tm, D), native dtype
    xf = x.astype(jnp.float32)
    d = xf.shape[-1]
    mean = jnp.mean(xf, axis=-1, keepdims=True)
    diff = xf - mean
    var = jnp.sum(diff * diff, axis=-1, keepdims=True) * (1.0 / max(d - 1, 1))
    inv = 1.0 / (jnp.sqrt(var) + EPS)
    n = params_ref[0] * diff * inv + params_ref[1]       # LayerNorm output (f32)

    y = jnp.dot(n.astype(w_ref.dtype), w_ref[...],
                preferred_element_type=jnp.float32)      # MXU
    y = y + b_ref[...].astype(jnp.float32)
    y = y.astype(x.dtype)                                # elementwise math in input dtype
    if p > 0.0:
        keep = r_ref[...] >= jnp.float32(p)
        y = jnp.where(keep, y * jnp.asarray(1.0 / (1.0 - p), y.dtype),
                      jnp.zeros_like(y))
    o_ref[...] = (x + y).astype(o_ref.dtype)


def fused_residual_linear_pallas(x2d, w, b, params, rnd2d, p):
    R, D = x2d.shape
    p = float(p)
    itemsize = jnp.dtype(x2d.dtype).itemsize
    sublane = _sublane(x2d.dtype)
    static_bytes = 2 * (w.size * jnp.dtype(w.dtype).itemsize
                        + b.size * jnp.dtype(b.dtype).itemsize)
    per_row = 2 * D * (2 * itemsize + (4 if p > 0.0 else 0))   # x, out (+ f32 rnd)
    budget = max(_TILE_VMEM_BUDGET - static_bytes, per_row * sublane)
    tm = _pick_tm(R, per_row, sublane=sublane, budget_bytes=budget)
    r_pad = _round_up(R, tm)

    b2d = b.reshape(1, D)
    inputs = [params, _maybe_pad_rows(x2d, r_pad), w, b2d]
    in_specs = [
        pl.BlockSpec(memory_space=pltpu.MemorySpace.SMEM),       # alpha/bias scalars
        pl.BlockSpec((tm, D), lambda i: (i, 0)),
        pl.BlockSpec((D, D), lambda i: (0, 0)),                  # resident weight tile
        pl.BlockSpec((1, D), lambda i: (0, 0)),
    ]
    if p > 0.0:
        inputs.append(_maybe_pad_rows(rnd2d, r_pad))
        in_specs.append(pl.BlockSpec((tm, D), lambda i: (i, 0)))

    out = pl.pallas_call(
        functools.partial(_fused_residual_linear_kernel, p=p),
        out_shape=jax.ShapeDtypeStruct((r_pad, D), x2d.dtype),
        grid=(r_pad // tm,),
        in_specs=in_specs,
        out_specs=pl.BlockSpec((tm, D), lambda i: (i, 0)),
        compiler_params=_COMPILER_PARAMS,
    )(*inputs)
    return out[:R] if r_pad != R else out


# --------------------------------------------------------------------------
# Module wrapper
# --------------------------------------------------------------------------
class ResidualConnection:
    def __init__(self, dropout: float):
        self.p = float(dropout)
        # LayerNorm params (shapes from the PyTorch __init__: torch.ones(1))
        self.alpha = jnp.ones((1,), jnp.float32)
        self.bias = jnp.ones((1,), jnp.float32)

    def _params(self):
        return jnp.concatenate([self.alpha, self.bias]).astype(jnp.float32)

    def _rand(self, rng, shape):
        if self.p == 0.0:
            return None
        if rng is None:
            raise ValueError("rng key required when dropout > 0")
        return jax.random.uniform(rng, shape, jnp.float32)

    def __call__(self, x, sublayer, *, rng=None):
        """Generic path: LN kernel -> arbitrary JAX sublayer -> dropout+add kernel."""
        B, S, D = x.shape
        x2d = x.reshape(B * S, D)
        normed = layernorm_pallas(x2d, self._params())
        y2d = sublayer(normed.reshape(B, S, D)).reshape(B * S, D)
        rnd = self._rand(rng, (B * S, D))
        out2d = dropout_add_pallas(x2d, y2d, rnd, self.p)
        return out2d.reshape(B, S, D)

    def fused_linear(self, x, w, b, *, rng=None):
        """Fully fused path when the sublayer is `h @ w + b` (one HBM pass)."""
        B, S, D = x.shape
        x2d = x.reshape(B * S, D)
        rnd = self._rand(rng, (B * S, D))
        out2d = fused_residual_linear_pallas(x2d, w, b, self._params(), rnd, self.p)
        return out2d.reshape(B, S, D)


if __name__ == "__main__":
    key = jax.random.PRNGKey(0)
    B, S, D = 2, 8, 128
    kx, kw = jax.random.split(key)
    x = jax.random.normal(kx, (B, S, D), dtype=jnp.float32)

    # Deterministic example sublayer: small linear (d_model -> d_model).
    W = jax.random.normal(kw, (D, D), dtype=jnp.float32) * 0.02
    b_lin = jnp.zeros((D,), jnp.float32)
    sublayer = lambda h: jnp.dot(h, W) + b_lin

    def ref(xr):
        mean = xr.mean(axis=-1, keepdims=True)
        std = xr.std(axis=-1, ddof=1, keepdims=True)     # torch.std is unbiased
        n = 1.0 * (xr - mean) / (std + EPS) + 1.0
        return xr + sublayer(n)

    # --- correctness with dropout disabled: generic and fused paths vs reference ---
    rc_eval = ResidualConnection(dropout=0.0)
    out_generic = jax.block_until_ready(rc_eval(x, sublayer))
    out_fused = jax.block_until_ready(rc_eval.fused_linear(x, W, b_lin))
    r = ref(x)
    assert jnp.allclose(out_generic, r, atol=1e-4, rtol=1e-4), "generic path mismatch"
    assert jnp.allclose(out_fused, r, atol=1e-3, rtol=1e-3), "fused path mismatch"

    # --- dropout active (train-mode semantics); same uniforms -> paths agree ---
    rc = ResidualConnection(dropout=0.1)
    rng = jax.random.PRNGKey(1234)
    out_g = jax.block_until_ready(rc(x, sublayer, rng=rng))
    out_f = jax.block_until_ready(rc.fused_linear(x, W, b_lin, rng=rng))
    assert out_g.shape == x.shape and bool(jnp.all(jnp.isfinite(out_g)))
    assert jnp.allclose(out_g, out_f, atol=1e-3, rtol=1e-3), "train-mode paths differ"

    print("KERNEL_OK")
</pallas_src>

<mosaic_0001>
module attributes {stable_mosaic.version = 11 : i64} {
  func.func @_layernorm_kernel(%arg0: i32, %arg1: memref<2xf32, #tpu.memory_space<smem>>, %arg2: memref<16x128xf32, #tpu.memory_space<vmem>>, %arg3: memref<16x128xf32, #tpu.memory_space<vmem>>) attributes {dimension_semantics = [#tpu.dimension_semantics<parallel>], iteration_bounds = array<i64: 1>, scalar_prefetch = 0 : i64, scratch_operands = 0 : i64, tpu.core_type = #tpu.core_type<tc>, window_params = [{transform_indices = @transform_0, window_bounds = array<i64: 2>}, {transform_indices = @transform_1, window_bounds = array<i64: 16, 128>}, {transform_indices = @transform_2, window_bounds = array<i64: 16, 128>}]} {
    %c0 = arith.constant 0 : index
    %c0_0 = arith.constant 0 : index
    %0 = vector.load %arg2[%c0, %c0_0] : memref<16x128xf32, #tpu.memory_space<vmem>>, vector<16x128xf32>
    %cst = arith.constant dense<0.000000e+00> : vector<16xf32>
    %1 = vector.multi_reduction <add>, %0, %cst [1] : vector<16x128xf32> to vector<16xf32>
    %2 = vector.shape_cast %1 : vector<16xf32> to vector<16x1xf32>
    %cst_1 = arith.constant 1.280000e+02 : f32
    %3 = vector.broadcast %cst_1 : f32 to vector<16x1xf32>
    %4 = arith.divf %2, %3 : vector<16x1xf32>
    %5 = vector.broadcast %4 : vector<16x1xf32> to vector<16x128xf32>
    %6 = arith.subf %0, %5 : vector<16x128xf32>
    %7 = arith.mulf %6, %6 : vector<16x128xf32>
    %cst_2 = arith.constant dense<0.000000e+00> : vector<16xf32>
    %8 = vector.multi_reduction <add>, %7, %cst_2 [1] : vector<16x128xf32> to vector<16xf32>
    %9 = vector.shape_cast %8 : vector<16xf32> to vector<16x1xf32>
    %cst_3 = arith.constant 0.00787401571 : f32
    %10 = vector.broadcast %cst_3 : f32 to vector<16x1xf32>
    %11 = arith.mulf %9, %10 : vector<16x1xf32>
    %12 = math.sqrt %11 : vector<16x1xf32>
    %cst_4 = arith.constant 9.99999997E-7 : f32
    %13 = vector.broadcast %cst_4 : f32 to vector<16x1xf32>
    %14 = arith.addf %12, %13 : vector<16x1xf32>
    %cst_5 = arith.constant 1.000000e+00 : f32
    %15 = vector.broadcast %cst_5 : f32 to vector<16x1xf32>
    %16 = arith.divf %15, %14 : vector<16x1xf32>
    %c0_6 = arith.constant 0 : index
    %17 = memref.load %arg1[%c0_6] : memref<2xf32, #tpu.memory_space<smem>>
    %18 = vector.broadcast %17 : f32 to vector<16x128xf32>
    %19 = arith.mulf %18, %6 : vector<16x128xf32>
    %20 = vector.broadcast %16 : vector<16x1xf32> to vector<16x128xf32>
    %21 = arith.mulf %19, %20 : vector<16x128xf32>
    %c1 = arith.constant 1 : index
    %22 = memref.load %arg1[%c1] : memref<2xf32, #tpu.memory_space<smem>>
    %23 = vector.broadcast %22 : f32 to vector<16x128xf32>
    %24 = arith.addf %21, %23 : vector<16x128xf32>
    %c0_7 = arith.constant 0 : index
    %c0_8 = arith.constant 0 : index
    %25 = vector.load %arg3[%c0_7, %c0_8] : memref<16x128xf32, #tpu.memory_space<vmem>>, vector<16x128xf32>
    tpu.vector_store %arg3[%c0_7, %c0_8], %24 {strides = array<i32>} : memref<16x128xf32, #tpu.memory_space<vmem>>, vector<16x128xf32>,
    return
  }
  func.func @transform_0(%arg0: i32) -> i32 {
    %c0_i32 = arith.constant 0 : i32
    %c0_i32_0 = arith.constant 0 : i32
    return %c0_i32 : i32
  }
  func.func @transform_1(%arg0: i32) -> (i32, i32) {
    %c0_i32 = arith.constant 0 : i32
    %c0_i32_0 = arith.constant 0 : i32
    return %arg0, %c0_i32 : i32, i32
  }
  func.func @transform_2(%arg0: i32) -> (i32, i32) {
    %c0_i32 = arith.constant 0 : i32
    %c0_i32_0 = arith.constant 0 : i32
    return %arg0, %c0_i32 : i32, i32
  }
}

</mosaic_0001>

<bundles_post_ra>
// kernel: tpu_custom_call.1
= control target key start
LH: loop header
LB: loop body
LE: loop exit
PB: predicated region body
PF: predicated region fallthrough
CT: control target
= control target key end

     0   :  { %7 = vsyncpa [#allocation5], 0  ;;  %s209_s0 = inlined_call_operand.hbm [shape: f32[2], index: 0, kind: input, shape index: {}]   ;;  %s210_s1 = inlined_call_operand.hbm [shape: f32[16,128], index: 1, kind: input, shape index: {}]   ;;  %s211_s2 = inlined_call_operand.hbm [shape: f32[16,128], index: 2, kind: output, shape index: {}]  }
   0x1   :  { %8 = vsyncpa [#allocation3], 0 }
   0x2   :  { %9 = vsyncpa [#allocation4], 0  ;;  %s174_s9 = smov [#allocation2]   ;;  %s175_s12 = smov [#allocation6]  }
   0x3   :  { %17 = dma.hbm_to_smem %s209_s0, 16, %s174_s9, [#allocation5]  }
   0x4   :  { %s23_s13 = sshll.u32 %s175_s12, 4  ;;  %s24_s13 = int_to_ptr.vmem [resolvable:$true] %s23_s13 }
   0x5   :  { %s136_s14 = scalar_lea.vmem %s24_s13, 256  ;;  %p141_p1 = scmp.lt.s32.totalorder %s24_s13, %s24_s13 }
   0x6   :  { %p137_p0 = scmp.ne.s32.totalorder %s24_s13, %s136_s14  ;;  %p142_p2 = scmp.lt.s32.totalorder %s136_s14, %s136_s14 }
   0x8   :  { %p143_p3 = por %p142_p2, %p141_p1 }
   0xa   :  { %p144_p4 = pnand %p143_p3, %p137_p0 }
   0xc   :  { %147 = shalt.err (!%p144_p4)
}
   0xd   :  { %s176_s15 = smov 128   ;;  %s177_s16 = smov 8  }
   0xe   :  { %29 = dma.hbm_to_vmem [thread:$0]  %s210_s1, 256, %s24_s13, [#allocation3], %s176_s15, %s176_s15, %s177_s16  }
   0xf   :  { %168 = dma.done.wait [#allocation5], 16  }
  0x10   :  { %169 = vsyncadd [#allocation5], 4294967280 }
  0x11   :  { %170 = dma.done.wait [#allocation3], 256  }
  0x12   :  { %171 = vsyncadd [#allocation3], 4294967040 }
  0x13   :  { %36 = sfence }
  0x14   :  { %v37_v0 = vld [vmem:[#allocation6] sm:$0xff]  ;;  %v38_v1 = vld [vmem:[#allocation6 + $0x8] sm:$0xff]  ;;  %s76_s0 = sld [smem:[#allocation2]]  ;;  %s178_s19 = smov [#allocation7]  }
  0x15   :  { %39 = vadd.xlane.f32.xlu0 %v37_v0  ;;  %s106_s1 = sld [smem:[#allocation2 + $0x1]]  ;;  %s93_s20 = sshll.u32 %s178_s19, 4  ;;  %s94_s20 = int_to_ptr.vmem [resolvable:$true] %s93_s20 }
  0x16   :  { %s148_s21 = scalar_lea.vmem %s94_s20, 256  ;;  %p153_p6 = scmp.lt.s32.totalorder %s94_s20, %s94_s20 }
  0x17   :  { %p149_p5 = scmp.ne.s32.totalorder %s94_s20, %s148_s21  ;;  %p154_p7 = scmp.lt.s32.totalorder %s148_s21, %s148_s21 }
  0x19   :  { %41 = vadd.xlane.f32.xlu0 %v38_v1  ;;  %p155_p8 = por %p154_p7, %p153_p6 }
  0x1a   :  { %v77_v26 = vstv %s76_s0 }
  0x1b   :  { %v83_v29 = vstv %s106_s1  ;;  %p156_p9 = pnand %p155_p8, %p149_p5 }
  0x9e   :  { %v40_v2 = vpop.xlane.xlu0 %39 }
  0x9f   :  { %v44_v3 = vmul.f32 0.0078125, %v40_v2 }
  0xa1   :  { %v46_v4 = vsub.f32 %v37_v0, %v44_v3 }
  0xa2   :  { %v42_v5 = vpop.xlane.xlu0 %41 }
  0xa3   :  { %v45_v6 = vmul.f32 0.0078125, %v42_v5  ;;  %v48_v7 = vmul.f32 %v46_v4, %v46_v4  ;;  %v78_v27 = vmul.f32 %v77_v26, %v46_v4 }
  0xa5   :  { %v47_v8 = vsub.f32 %v38_v1, %v45_v6  ;;  %50 = vadd.xlane.f32.xlu1 %v48_v7 }
  0xa7   :  { %v49_v9 = vmul.f32 %v47_v8, %v47_v8  ;;  %v79_v31 = vmul.f32 %v77_v26, %v47_v8 }
  0xa9   :  { %52 = vadd.xlane.f32.xlu1 %v49_v9 }
 0x12e   :  { %v51_v10 = vpop.xlane.xlu1 %50 }
 0x12f   :  { %v54_v11 = vmul.f32 0.007874016, %v51_v10 }
 0x131   :  { %112 = vrsqrt.f32 %v54_v11  ;;  %vm58_vm0 = vcmp.eq.f32.partialorder %v54_v11, inf  ;;  %v61_v16 = vand.u32 2147483648, %v54_v11  ;;  %vm60_vm1 = vcmp.eq.f32.partialorder %v54_v11, 0.0 }
 0x132   :  { %v53_v12 = vpop.xlane.xlu1 %52 }
 0x133   :  { %v55_v13 = vmul.f32 0.007874016, %v53_v12 }
 0x135   :  { %114 = vrsqrt.f32 %v55_v13  ;;  %vm65_vm2 = vcmp.eq.f32.partialorder %v55_v13, inf  ;;  %v68_v22 = vand.u32 2147483648, %v55_v13  ;;  %vm67_vm3 = vcmp.eq.f32.partialorder %v55_v13, 0.0 }
 0x13e   :  { %v113_v14 = vpop.eup %112 }
 0x13f   :  { %v57_v15 = vmul.f32 %v113_v14, %v54_v11 }
 0x141   :  { %v59_v17 = vsel %vm58_vm0, %v54_v11, %v57_v15 }
 0x142   :  { %v115_v18 = vpop.eup %114  ;;  %v62_v19 = vsel %vm60_vm1, %v61_v16, %v59_v17 }
 0x143   :  { %v64_v20 = vmul.f32 %v115_v18, %v55_v13  ;;  %v70_v21 = vadd.f32 1e-06, %v62_v19 }
 0x145   :  { %v66_v23 = vsel %vm65_vm2, %v55_v13, %v64_v20  ;;  %116 = vrcp.f32 %v70_v21 }
 0x146   :  { %v69_v24 = vsel %vm67_vm3, %v68_v22, %v66_v23 }
 0x147   :  { %v71_v25 = vadd.f32 1e-06, %v69_v24 }
 0x149   :  { %118 = vrcp.f32 %v71_v25 }
 0x152   :  { %v117_v28 = vpop.eup %116 }
 0x153   :  { %v80_v30 = vmul.f32 %v117_v28, %v78_v27 }
 0x155   :  { %v84_v32 = vadd.f32 %v83_v29, %v80_v30 }
 0x156   :  { %v119_v33 = vpop.eup %118 }
 0x157   :  { %v81_v34 = vmul.f32 %v119_v33, %v79_v31  ;;  %86 = vst [vmem:[#allocation7] sm:$0xff] %v84_v32 }
 0x159   :  { %v85_v35 = vadd.f32 %v83_v29, %v81_v34 }
 0x15b   :  { %87 = vst [vmem:[#allocation7 + $0x8] sm:$0xff] %v85_v35 }
 0x15c   :  { %159 = shalt.err (!%p156_p9)
}
 0x15d   :  { %99 = dma.vmem_to_hbm [thread:$0]  %s94_s20, 256, %s211_s2, [#allocation4], %s176_s15, %s176_s15, %s177_s16  }
 0x15e   :  { %172 = dma.done.wait [#allocation4], 256  }
 0x15f   :  { %173 = vsyncadd [#allocation4], 4294967040 }
 0x160   :  { %103 = vsyncpa [#allocation3], 1 }
 0x161   :  { %104 = vsyncpa [#allocation4], 1 }
 0x162   :  { %105 = vsyncpa [#allocation5], 1 }

</bundles_post_ra>
